<compile_context>
chip_gen: v7x
topology: tpu7x:2x2x1
jax: 0.10.0
libtpu: 0.0.40
codegen_flags: <defaults>
</compile_context>

<pallas_src>
import functools

import jax
import jax.numpy as jnp
from jax import lax
from jax.experimental import pallas as pl
from jax.experimental.pallas import tpu as pltpu


_PALLAS_MIN_BYTES = 1 << 20            # below this, plain XLA wins (fixed overhead)
_VMEM_BLOCK_BUDGET = 8 * 1024 * 1024   # target bytes per (double-buffered) input block
_VMEM_LIMIT_CAP = 48 * 1024 * 1024     # stay well under v7x's 64 MiB physical VMEM


def _legal_batch_tile(tb, B):
    """Batch tile: the full B, or a multiple of 8 (sublane) when tiling."""
    tb = max(1, min(int(tb), int(B)))
    if tb >= B or B <= 8:
        return int(B)
    return max(8, (tb // 8) * 8)


def _legal_seq_tile(tn, N, pack):
    """Sequence tile: the full N, or a multiple of the dtype packing factor."""
    tn = max(1, min(int(tn), int(N)))
    if tn >= N or N <= pack:
        return int(N)
    return max(pack, (tn // pack) * pack)


def _pick_mean_tiles(B, N, D, itemsize, block_b, block_n):
    # Sublane packing factor: f32 -> 8 rows/tile, bf16 -> 16, int8/fp8 -> 32.
    pack = max(8, 32 // max(int(itemsize), 1))
    row_bytes = max(D * itemsize, 1)

    tb = _legal_batch_tile(block_b if block_b is not None else 8, B)

    if block_n is not None:
        # Legalize user-provided block_n (must be full N or packing-aligned).
        return tb, _legal_seq_tile(block_n, N, pack)

    # Sequence tile that fills the VMEM budget at the current batch tile.
    tn = _legal_seq_tile(_VMEM_BLOCK_BUDGET // max(tb * row_bytes, 1), N, pack)

    if tn >= N and block_b is None:
        # Whole sequence fits in one tile: grow the batch tile to fill the
        # budget instead (large-B / short-N shapes otherwise pay the per-step
        # overhead on ~hundred-KB blocks).
        tb = _legal_batch_tile(_VMEM_BLOCK_BUDGET // max(N * row_bytes, 1), B)
        if tb >= B and B > 8:
            # Keep >= 2 batch-grid steps so the "parallel" batch axis can
            # shard across the 2 TensorCores on v7x (kernel is pure HBM BW).
            tb = _legal_batch_tile((B + 1) // 2, B)
    return tb, tn


def _vmem_limit(*block_bytes):
    # Double-buffered blocks + a small margin for internal scratch.
    need = 2 * sum(int(b) for b in block_bytes) + (2 << 20)
    return int(min(_VMEM_LIMIT_CAP, max(24 << 20, need)))


def _make_mean_kernel(n, tn, inv_n):
    needs_mask = (n % tn) != 0  # static: only the last sequence tile is partial

    def kernel(x_ref, o_ref, acc_ref):
        k = pl.program_id(1)
        k_last = pl.num_programs(1) - 1

        @pl.when(k == 0)
        def _():
            acc_ref[...] = jnp.zeros_like(acc_ref)

        if needs_mask:
            # Unmasked fast path for interior tiles.
            @pl.when(k != k_last)
            def _():
                acc_ref[...] += jnp.sum(x_ref[...].astype(jnp.float32), axis=1)

            # Last tile: zero the padded tail rows (their DMA'd contents are
            # undefined) before accumulating.
            @pl.when(k == k_last)
            def _():
                x = x_ref[...].astype(jnp.float32)                 # (TB, TN, D)
                seq = k * tn + lax.broadcasted_iota(jnp.int32, (tn, 1), 0)
                x = jnp.where((seq < n)[None, :, :], x, 0.0)
                acc_ref[...] += jnp.sum(x, axis=1)
        else:
            acc_ref[...] += jnp.sum(x_ref[...].astype(jnp.float32), axis=1)

        @pl.when(k == k_last)
        def _():
            # Single multiply by 1/N at the end (no per-tile divide).  Rows
            # belonging to batch padding (B % tb != 0) hold garbage but are
            # dropped by Pallas on write-back of the partial output block.
            o_ref[...] = (acc_ref[...] * inv_n).astype(o_ref.dtype)

    return kernel


def _cls_kernel(x_ref, o_ref):
    # x_ref: (TB, min(N,8), D) — a single rectangular DMA per grid step; only
    # token 0 of each batch row is used.
    o_ref[...] = x_ref[:, 0, :]


@functools.partial(
    jax.jit, static_argnames=("pool", "force_pallas", "block_b", "block_n")
)
def pooling(x, pool="mean", *, force_pallas=False, block_b=None, block_n=None):
    """Equivalent of Pooling(pool).forward(x) for x of shape [B, N, D]."""
    if pool not in ("mean", "cls"):
        raise ValueError("pool must be one of {mean, cls}")
    B, N, D = x.shape
    itemsize = x.dtype.itemsize

    if pool == "cls":
        # cls moves only B*D bytes; XLA lowers x[:, 0] to one strided copy,
        # which beats any Pallas grid.  A Pallas path is kept only so the
        # kernel can be exercised explicitly (force_pallas=True).
        if not force_pallas:
            return x[:, 0]

        tn0 = min(N, 8)  # smallest sublane-legal sequence block holding token 0
        row_bytes = max(tn0 * D * itemsize, 1)
        if block_b is not None:
            tb = _legal_batch_tile(block_b, B)
        else:
            tb = _legal_batch_tile(max(1, _VMEM_BLOCK_BUDGET // row_bytes), B)
        in_block_bytes = tb * tn0 * D * itemsize
        out_block_bytes = tb * D * itemsize

        return pl.pallas_call(
            _cls_kernel,
            out_shape=jax.ShapeDtypeStruct((B, D), x.dtype),
            grid_spec=pltpu.PrefetchScalarGridSpec(
                num_scalar_prefetch=0,
                grid=(pl.cdiv(B, tb),),
                in_specs=[pl.BlockSpec((tb, tn0, D), lambda b: (b, 0, 0))],
                out_specs=pl.BlockSpec((tb, D), lambda b: (b, 0)),
            ),
            compiler_params=pltpu.CompilerParams(
                dimension_semantics=("parallel",),
                vmem_limit_bytes=_vmem_limit(in_block_bytes, out_block_bytes),
            ),
            cost_estimate=pl.CostEstimate(
                flops=0,
                transcendentals=0,
                bytes_accessed=B * tn0 * D * itemsize + B * D * itemsize,
            ),
        )(x)

    # ---- mean pool ----
    if not force_pallas and x.size * itemsize < _PALLAS_MIN_BYTES:
        return jnp.mean(x, axis=1)  # tiny-input bypass: call overhead dominates

    tb, tn = _pick_mean_tiles(B, N, D, itemsize, block_b, block_n)
    in_block_bytes = tb * tn * D * itemsize
    out_block_bytes = tb * D * itemsize
    acc_bytes = tb * D * 4

    kernel = _make_mean_kernel(N, tn, 1.0 / N)
    return pl.pallas_call(
        kernel,
        out_shape=jax.ShapeDtypeStruct((B, D), x.dtype),
        grid_spec=pltpu.PrefetchScalarGridSpec(
            num_scalar_prefetch=0,
            grid=(pl.cdiv(B, tb), pl.cdiv(N, tn)),   # reduction axis last
            in_specs=[pl.BlockSpec((tb, tn, D), lambda b, k: (b, k, 0))],
            out_specs=pl.BlockSpec((tb, D), lambda b, k: (b, 0)),
            scratch_shapes=[pltpu.VMEM((tb, D), jnp.float32)],
        ),
        compiler_params=pltpu.CompilerParams(
            dimension_semantics=("parallel", "arbitrary"),
            vmem_limit_bytes=_vmem_limit(in_block_bytes, out_block_bytes, acc_bytes),
        ),
        cost_estimate=pl.CostEstimate(
            flops=B * N * D,
            transcendentals=0,
            bytes_accessed=B * N * D * itemsize + B * D * itemsize,
        ),
    )(x)


if __name__ == "__main__":
    key = jax.random.PRNGKey(0)

    # --- small shapes matching the module convention: [batch, seq, hidden] ---
    B, N, D = 2, 8, 32
    x = jax.random.normal(key, (B, N, D), dtype=jnp.float32)

    out_mean = jax.block_until_ready(pooling(x, pool="mean", force_pallas=True))
    assert out_mean.shape == (B, D)
    assert jnp.allclose(out_mean, jnp.mean(x, axis=1), atol=1e-5, rtol=1e-5)

    out_cls = jax.block_until_ready(pooling(x, pool="cls", force_pallas=True))
    assert out_cls.shape == (B, D)
    assert jnp.allclose(out_cls, x[:, 0], atol=1e-6, rtol=1e-6)

    # --- default (non-forced) paths: XLA bypasses for tiny / cls inputs ---
    assert jnp.allclose(jax.block_until_ready(pooling(x, pool="mean")),
                        jnp.mean(x, axis=1), atol=1e-5, rtol=1e-5)
    assert jnp.allclose(jax.block_until_ready(pooling(x, pool="cls")),
                        x[:, 0], atol=1e-6, rtol=1e-6)

    # --- exercise batch tiling + sequence-tiled (masked last tile) path ---
    B2, N2, D2 = 16, 37, 128          # N2 % block_n != 0 -> masked last tile
    x2 = jax.random.normal(jax.random.PRNGKey(0), (B2, N2, D2), dtype=jnp.float32)

    out2 = jax.block_until_ready(
        pooling(x2, pool="mean", force_pallas=True, block_b=8, block_n=8)
    )
    assert out2.shape == (B2, D2)
    assert jnp.allclose(out2, jnp.mean(x2, axis=1), atol=1e-5, rtol=1e-5)

    out2_cls = jax.block_until_ready(
        pooling(x2, pool="cls", force_pallas=True, block_b=8)
    )
    assert jnp.allclose(out2_cls, x2[:, 0], atol=1e-6, rtol=1e-6)

    # --- large-B / short-N shape: auto-grown batch tile, no user hints ---
    B3, N3, D3 = 64, 16, 128
    x3 = jax.random.normal(jax.random.PRNGKey(1), (B3, N3, D3), dtype=jnp.float32)
    out3 = jax.block_until_ready(pooling(x3, pool="mean", force_pallas=True))
    assert jnp.allclose(out3, jnp.mean(x3, axis=1), atol=1e-5, rtol=1e-5)

    print("KERNEL_OK")
</pallas_src>

<mosaic_0001>
module attributes {stable_mosaic.version = 11 : i64} {
  func.func @kernel(%arg0: i32, %arg1: i32, %arg2: memref<2x8x32xf32, #tpu.memory_space<vmem>>, %arg3: memref<2x32xf32, #tpu.memory_space<vmem>>, %arg4: memref<2x32xf32, #tpu.memory_space<vmem>>) attributes {dimension_semantics = [#tpu.dimension_semantics<parallel>, #tpu.dimension_semantics<arbitrary>], iteration_bounds = array<i64: 1, 1>, scalar_prefetch = 0 : i64, scratch_operands = 1 : i64, tpu.core_type = #tpu.core_type<tc>, window_params = [{transform_indices = @transform_0, window_bounds = array<i64: 2, 8, 32>}, {transform_indices = @transform_1, window_bounds = array<i64: 2, 32>}]} {
    %c0_i32 = arith.constant 0 : i32
    %0 = arith.cmpi eq, %arg1, %c0_i32 : i32
    %1 = arith.extui %0 : i1 to i32
    %c0_i32_0 = arith.constant 0 : i32
    %2 = arith.cmpi ne, %1, %c0_i32_0 : i32
    scf.if %2 {
      %cst_9 = arith.constant 0.000000e+00 : f32
      %11 = vector.broadcast %cst_9 : f32 to vector<2x32xf32>
      %c0_10 = arith.constant 0 : index
      %c0_11 = arith.constant 0 : index
      %12 = vector.load %arg4[%c0_10, %c0_11] : memref<2x32xf32, #tpu.memory_space<vmem>>, vector<2x32xf32>
      tpu.vector_store %arg4[%c0_10, %c0_11], %11 {strides = array<i32>} : memref<2x32xf32, #tpu.memory_space<vmem>>, vector<2x32xf32>,
    } else {
    }
    %c0 = arith.constant 0 : index
    %c0_1 = arith.constant 0 : index
    %3 = vector.load %arg4[%c0, %c0_1] : memref<2x32xf32, #tpu.memory_space<vmem>>, vector<2x32xf32>
    %c0_2 = arith.constant 0 : index
    %c0_3 = arith.constant 0 : index
    %c0_4 = arith.constant 0 : index
    %4 = vector.load %arg2[%c0_2, %c0_3, %c0_4] : memref<2x8x32xf32, #tpu.memory_space<vmem>>, vector<2x8x32xf32>
    %cst = arith.constant dense<0.000000e+00> : vector<2x32xf32>
    %5 = vector.multi_reduction <add>, %4, %cst [1] : vector<2x8x32xf32> to vector<2x32xf32>
    %6 = arith.addf %3, %5 : vector<2x32xf32>
    %c0_5 = arith.constant 0 : index
    %c0_6 = arith.constant 0 : index
    %7 = vector.load %arg4[%c0_5, %c0_6] : memref<2x32xf32, #tpu.memory_space<vmem>>, vector<2x32xf32>
    tpu.vector_store %arg4[%c0_5, %c0_6], %6 {strides = array<i32>} : memref<2x32xf32, #tpu.memory_space<vmem>>, vector<2x32xf32>,
    %c0_i32_7 = arith.constant 0 : i32
    %8 = arith.cmpi eq, %arg1, %c0_i32_7 : i32
    %9 = arith.extui %8 : i1 to i32
    %c0_i32_8 = arith.constant 0 : i32
    %10 = arith.cmpi ne, %9, %c0_i32_8 : i32
    scf.if %10 {
      %c0_9 = arith.constant 0 : index
      %c0_10 = arith.constant 0 : index
      %11 = vector.load %arg4[%c0_9, %c0_10] : memref<2x32xf32, #tpu.memory_space<vmem>>, vector<2x32xf32>
      %cst_11 = arith.constant 1.250000e-01 : f32
      %12 = vector.broadcast %cst_11 : f32 to vector<2x32xf32>
      %13 = arith.mulf %11, %12 : vector<2x32xf32>
      %c0_12 = arith.constant 0 : index
      %c0_13 = arith.constant 0 : index
      %14 = vector.load %arg3[%c0_12, %c0_13] : memref<2x32xf32, #tpu.memory_space<vmem>>, vector<2x32xf32>
      tpu.vector_store %arg3[%c0_12, %c0_13], %13 {strides = array<i32>} : memref<2x32xf32, #tpu.memory_space<vmem>>, vector<2x32xf32>,
    } else {
    }
    return
  }
  func.func @transform_0(%arg0: i32, %arg1: i32) -> (i32, i32, i32) {
    %c0_i32 = arith.constant 0 : i32
    %c0_i32_0 = arith.constant 0 : i32
    return %arg0, %arg1, %c0_i32 : i32, i32, i32
  }
  func.func @transform_1(%arg0: i32, %arg1: i32) -> (i32, i32) {
    %c0_i32 = arith.constant 0 : i32
    %c0_i32_0 = arith.constant 0 : i32
    return %arg0, %c0_i32 : i32, i32
  }
}

</mosaic_0001>

<bundles_post_ra>
// kernel: pooling.1
= control target key start
LH: loop header
LB: loop body
LE: loop exit
PB: predicated region body
PF: predicated region fallthrough
CT: control target
= control target key end

     0   :  { %6 = vsyncpa [#allocation4], 0  ;;  %s171_s0 = inlined_call_operand.hbm [shape: f32[2,8,32], index: 0, kind: input, shape index: {}]   ;;  %s172_s1 = inlined_call_operand.hbm [shape: f32[2,32], index: 1, kind: output, shape index: {}]  }
   0x1   :  { %7 = vsyncpa [#allocation5], 0  ;;  %s129_s6 = smov [#allocation3]   ;;  %s81_s10 = scalar_lea.hbm %s171_s0, 256 }
   0x2   :  { %s13_s7 = sshll.u32 %s129_s6, 4  ;;  %p82_p0 = scmp.ne.s32.totalorder %s171_s0, %s81_s10  ;;  %s14_s7 = int_to_ptr.vmem [resolvable:$true] %s13_s7 }
   0x3   :  { %p85_p1 = scmp.lt.u32.totalorder %s81_s10, %s171_s0 }
   0x5   :  { %p87_p2 = pnand %p85_p1, %p82_p0 }
   0x7   :  { %90 = shalt.err (!%p87_p2)
}
   0x8   :  { %s91_s15 = scalar_lea.vmem %s14_s7, 256  ;;  %p96_p4 = scmp.lt.s32.totalorder %s14_s7, %s14_s7 }
   0x9   :  { %p92_p3 = scmp.ne.s32.totalorder %s14_s7, %s91_s15  ;;  %p97_p5 = scmp.lt.s32.totalorder %s91_s15, %s91_s15 }
   0xb   :  { %p98_p6 = por %p97_p5, %p96_p4 }
   0xd   :  { %p99_p7 = pnand %p98_p6, %p92_p3 }
   0xf   :  { %102 = shalt.err (!%p99_p7)
}
  0x10   :  { %s130_s16 = smov 128   ;;  %s131_s17 = smov 8  }
  0x11   :  { %19 = dma.hbm_to_vmem [thread:$0]  %s171_s0, 256, %s14_s7, [#allocation4], %s130_s16, %s130_s16, %s131_s17  }
  0x12   :  { %125 = dma.done.wait [#allocation4], 256  }
  0x13   :  { %126 = vsyncadd [#allocation4], 4294967040  ;;  %vm27_vm0 = vcmask 254976   ;;  %v132_v0 = vmov 0.0   ;;  %vm32_vm1 = vcmask 261120   ;;  %v30_v1 = vld [vmem:[#allocation3] sm:$0xff] }
  0x14   :  { %28 = vst.msk [vmem:[#allocation2] sm:$0x3] %vm27_vm0, %v132_v0  ;;  %v31_v2 = vld [vmem:[#allocation3 + $0x8] sm:$0xff]  ;;  %v33_v3 = vsel %vm32_vm1, %v30_v1, 0.0  ;;  %vm49_vm2 = vcmask 1041409   ;;  %s133_s0 = smov [#allocation6]  }
  0x15   :  { %v40_v4 = vsel %vm32_vm1, %v31_v2, 0.0  ;;  %v34_v5 = vrot.slane %v33_v3, 4  ;;  %s67_s20 = sshll.u32 %s133_s0, 4  ;;  %s68_s20 = int_to_ptr.vmem [resolvable:$true] %s67_s20 }
  0x16   :  { %v41_v6 = vrot.slane %v40_v4, 4  ;;  %s103_s21 = scalar_lea.vmem %s68_s20, 32  ;;  %p108_p9 = scmp.lt.s32.totalorder %s68_s20, %s68_s20 }
  0x17   :  { %v35_v7 = vadd.f32 %v34_v5, %v33_v3  ;;  %p104_p8 = scmp.ne.s32.totalorder %s68_s20, %s103_s21  ;;  %p109_p10 = scmp.lt.s32.totalorder %s103_s21, %s103_s21 }
  0x18   :  { %v42_v8 = vadd.f32 %v41_v6, %v40_v4 }
  0x19   :  { %v36_v9 = vrot.slane %v35_v7, 2  ;;  %p110_p11 = por %p109_p10, %p108_p9 }
  0x1a   :  { %v43_v10 = vrot.slane %v42_v8, 2 }
  0x1b   :  { %v37_v11 = vadd.f32 %v36_v9, %v35_v7  ;;  %v29_v15 = vld [vmem:[#allocation2] sm:$0x3]  ;;  %p111_p12 = pnand %p110_p11, %p104_p8 }
  0x1c   :  { %v44_v12 = vadd.f32 %v43_v10, %v42_v8 }
  0x1d   :  { %v38_v13 = vrot.slane %v37_v11, 1 }
  0x1e   :  { %v45_v14 = vrot.slane %v44_v12, 1 }
  0x1f   :  { %v39_v16 = vadd.f32 %v38_v13, %v37_v11 }
  0x20   :  { %v46_v17 = vadd.f32 %v45_v14, %v44_v12 }
  0x22   :  { %v50_v18 = vsel %vm49_vm2, %v46_v17, %v39_v16 }
  0x23   :  { %v52_v19 = vadd.f32 %v50_v18, %v29_v15 }
  0x25   :  { %54 = vst.msk [vmem:[#allocation2] sm:$0x3] %vm27_vm0, %v52_v19 }
  0x2c   :  { %v58_v20 = vld [vmem:[#allocation2] sm:$0x3] }
  0x2d   :  { %v59_v21 = vmul.f32 0.125, %v58_v20 }
  0x2f   :  { %60 = vst.msk [vmem:[#allocation6] sm:$0x3] %vm27_vm0, %v59_v21 }
  0x30   :  { %114 = shalt.err (!%p111_p12)
}
  0x31   :  { %s115_s24 = scalar_lea.hbm %s172_s1, 32 }
  0x32   :  { %p116_p13 = scmp.ne.s32.totalorder %s172_s1, %s115_s24  ;;  %p119_p0 = scmp.lt.u32.totalorder %s115_s24, %s172_s1 }
  0x34   :  { %p121_p1 = pnand %p119_p0, %p116_p13 }
  0x36   :  { %124 = shalt.err (!%p121_p1)
}
  0x37   :  { %70 = dma.vmem_to_hbm [thread:$0]  %s68_s20, 32, %s172_s1, [#allocation5]  }
  0x38   :  { %127 = dma.done.wait [#allocation5], 32  }
  0x39   :  { %128 = vsyncadd [#allocation5], 4294967264 }
  0x3a   :  { %74 = vsyncpa [#allocation4], 1 }
  0x3b   :  { %75 = vsyncpa [#allocation5], 1 }

</bundles_post_ra>
